<compile_context>
chip_gen: v7x
topology: tpu7x:2x2x1
jax: 0.10.0
libtpu: 0.0.40
codegen_flags: <defaults>
</compile_context>

<pallas_src>
import functools
import math

import jax
import jax.numpy as jnp
from jax.experimental import pallas as pl
from jax.experimental.pallas import tpu as pltpu

HIDDEN = 128


# ----------------------------------------------------------------------------
# Pallas kernel
# ----------------------------------------------------------------------------
def network_kernel(x_ref, w1_ref, b1_ref, wh_ref, bh_ref, whead_ref, bhead_ref,
                   sup_ref, q_ref, *, out_dim, atom_size):
    tb = x_ref.shape[0]                                            # batch tile
    A = out_dim * atom_size

    x = x_ref[...]                                                 # [tb, in_dim]

    # feature_layer: Linear(in_dim, 128) + ReLU
    h = jnp.dot(x, w1_ref[...], preferred_element_type=jnp.float32) + b1_ref[...]
    h = jnp.maximum(h, 0.0)                                        # [tb, 128]

    # fused advantage/value hidden NoisyLinear(128,128)+ReLU -> [adv_h | val_h]
    y = jnp.dot(h, wh_ref[...], preferred_element_type=jnp.float32) + bh_ref[...]
    y = jnp.maximum(y, 0.0)                                        # [tb, 256]

    # fused block-diagonal head: [adv(a=0..out_dim-1, each atom wide) | val]
    head = jnp.dot(y, whead_ref[...], preferred_element_type=jnp.float32) + bhead_ref[...]
    adv = head[:, :A]                                              # [tb, out_dim*atom]
    val = head[:, A:]                                              # [tb, atom]

    # mean over actions (static lane-slice sum; no reshape, no extra matmul)
    adv_blocks = [adv[:, a * atom_size:(a + 1) * atom_size] for a in range(out_dim)]
    adv_sum = adv_blocks[0]
    for a in range(1, out_dim):
        adv_sum = adv_sum + adv_blocks[a]
    adv_mean = adv_sum * (1.0 / out_dim)                           # [tb, atom]

    combine = val - adv_mean                                       # [tb, atom]

    # stack all actions along the sublane axis -> single softmax over [out_dim*tb, atom]
    q_atoms = jnp.concatenate([blk + combine for blk in adv_blocks], axis=0)

    m = jnp.max(q_atoms, axis=-1, keepdims=True)
    e = jnp.exp(q_atoms - m)
    inv = pl.reciprocal(jnp.sum(e, axis=-1, keepdims=True), approx=True)
    dist = jnp.maximum(e * inv, 0.001)                             # clamp(min=0.001)

    # expected value: one MXU dot with support as a column vector [atom, 1]
    qcol = jnp.dot(dist, sup_ref[...], preferred_element_type=jnp.float32)  # [out_dim*tb, 1]

    # un-stack: q[b, a] = qcol[a*tb + b]; assemble once, store once
    q_out = jnp.concatenate([qcol[a * tb:(a + 1) * tb, :] for a in range(out_dim)], axis=1)
    q_ref[...] = q_out                                             # [tb, out_dim]


# ----------------------------------------------------------------------------
# One-time parameter preparation (keep transposes/packing off the call path)
# ----------------------------------------------------------------------------
def prepare_params(params, out_dim, atom_size, hidden=HIDDEN):
    A = out_dim * atom_size
    w1 = params['w1'].T                                            # [in_dim, 128]
    b1 = params['b1'].reshape(1, hidden)

    # fused hidden weight: [128, 256] = [adv_hidden | val_hidden]
    w_hid = jnp.concatenate([params['wah'].T, params['wvh'].T], axis=1)
    b_hid = jnp.concatenate([params['bah'], params['bvh']]).reshape(1, 2 * hidden)

    # fused block-diagonal head: [256, out_dim*atom + atom]
    #   rows 0:128   (adv_h) -> advantage columns
    #   rows 128:256 (val_h) -> value columns
    w_head = jnp.zeros((2 * hidden, A + atom_size), jnp.float32)
    w_head = w_head.at[:hidden, :A].set(params['wa'].T)            # [128, out_dim*atom]
    w_head = w_head.at[hidden:, A:].set(params['wv'].T)            # [128, atom]
    b_head = jnp.concatenate([params['ba'], params['bv']]).reshape(1, A + atom_size)

    sup_col = params['support'].reshape(atom_size, 1)              # [atom, 1] for MXU dot
    return dict(w1=w1, b1=b1, w_hid=w_hid, b_hid=b_hid,
                w_head=w_head, b_head=b_head, sup=sup_col)


def network_forward(x, prepped, out_dim, atom_size):
    B, in_dim = x.shape
    hidden = prepped['w1'].shape[1]
    A = out_dim * atom_size

    # Batch grid: shards across TensorCores (megacore) and bounds VMEM for large B.
    tile_b = B if B <= 512 else 512
    grid = (pl.cdiv(B, tile_b),)

    def resident(shape):  # full-array block, same block every step -> stays in VMEM
        return pl.BlockSpec(shape, lambda i: (0, 0))

    kernel = functools.partial(network_kernel, out_dim=out_dim, atom_size=atom_size)
    return pl.pallas_call(
        kernel,
        out_shape=jax.ShapeDtypeStruct((B, out_dim), jnp.float32),
        grid=grid,
        in_specs=[
            pl.BlockSpec((tile_b, in_dim), lambda i: (i, 0)),          # x
            resident((in_dim, hidden)), resident((1, hidden)),          # w1, b1
            resident((hidden, 2 * hidden)), resident((1, 2 * hidden)),  # w_hid, b_hid
            resident((2 * hidden, A + atom_size)),
            resident((1, A + atom_size)),                               # w_head, b_head
            resident((atom_size, 1)),                                   # support column
        ],
        out_specs=pl.BlockSpec((tile_b, out_dim), lambda i: (i, 0)),
        compiler_params=pltpu.CompilerParams(
            dimension_semantics=("parallel",)),
    )(x, prepped['w1'], prepped['b1'], prepped['w_hid'], prepped['b_hid'],
      prepped['w_head'], prepped['b_head'], prepped['sup'])


# ----------------------------------------------------------------------------
# Deterministic parameter construction (plain JAX glue)
# ----------------------------------------------------------------------------
def _scale_noise(key, size):
    v = jax.random.normal(key, (size,), jnp.float32)
    return jnp.sign(v) * jnp.sqrt(jnp.abs(v))


def init_linear(key, in_f, out_f):
    k1, k2 = jax.random.split(key)
    bound = 1.0 / math.sqrt(in_f)
    w = jax.random.uniform(k1, (out_f, in_f), jnp.float32, -bound, bound)
    b = jax.random.uniform(k2, (out_f,), jnp.float32, -bound, bound)
    return w, b


def init_noisy(key, in_f, out_f, std_init=0.5):
    # Effective dense weight/bias with the factorized noise folded in.
    k1, k2, k3, k4 = jax.random.split(key, 4)
    mean_range = 1.0 / math.sqrt(in_f)
    w_mean = jax.random.uniform(k1, (out_f, in_f), jnp.float32, -mean_range, mean_range)
    w_std = jnp.full((out_f, in_f), std_init / math.sqrt(in_f), jnp.float32)
    b_mean = jax.random.uniform(k2, (out_f,), jnp.float32, -mean_range, mean_range)
    b_std = jnp.full((out_f,), std_init / math.sqrt(out_f), jnp.float32)
    eps_in = _scale_noise(k3, in_f)
    eps_out = _scale_noise(k4, out_f)
    w = w_mean + w_std * jnp.outer(eps_out, eps_in)
    b = b_mean + b_std * eps_out
    return w, b


# ----------------------------------------------------------------------------
# Pure-JAX reference (mirrors the PyTorch forward exactly)
# ----------------------------------------------------------------------------
def reference_forward(x, params, out_dim, atom_size):
    h = jax.nn.relu(x @ params['w1'].T + params['b1'])
    adv_h = jax.nn.relu(h @ params['wah'].T + params['bah'])
    val_h = jax.nn.relu(h @ params['wvh'].T + params['bvh'])
    adv = (adv_h @ params['wa'].T + params['ba']).reshape(-1, out_dim, atom_size)
    val = (val_h @ params['wv'].T + params['bv']).reshape(-1, 1, atom_size)
    q_atoms = val + adv - adv.mean(axis=1, keepdims=True)
    dist = jax.nn.softmax(q_atoms, axis=-1)
    dist = jnp.maximum(dist, 0.001)
    return jnp.sum(dist * params['support'], axis=2)


if __name__ == "__main__":
    # Small shapes consistent with the module
    B, IN_DIM, OUT_DIM, ATOM = 8, 16, 4, 8
    V_MIN, V_MAX = -10.0, 10.0

    key = jax.random.PRNGKey(0)
    kx, k1, k2, k3, k4, k5 = jax.random.split(key, 6)

    x = jax.random.normal(kx, (B, IN_DIM), jnp.float32)
    support = jnp.linspace(V_MIN, V_MAX, ATOM, dtype=jnp.float32)

    w1, b1 = init_linear(k1, IN_DIM, HIDDEN)
    wah, bah = init_noisy(k2, HIDDEN, HIDDEN)
    wa, ba = init_noisy(k3, HIDDEN, OUT_DIM * ATOM)
    wvh, bvh = init_noisy(k4, HIDDEN, HIDDEN)
    wv, bv = init_noisy(k5, HIDDEN, ATOM)

    params = dict(w1=w1, b1=b1, wah=wah, bah=bah, wvh=wvh, bvh=bvh,
                  wa=wa, ba=ba, wv=wv, bv=bv, support=support)

    # One-time layout/packing prep (kept off the per-call critical path).
    prepped = jax.tree_util.tree_map(jax.block_until_ready,
                                     prepare_params(params, OUT_DIM, ATOM))

    q = network_forward(x, prepped, OUT_DIM, ATOM)
    q = jax.block_until_ready(q)

    q_ref = reference_forward(x, params, OUT_DIM, ATOM)
    assert q.shape == (B, OUT_DIM)
    # Slightly loosened tolerance to cover the approximate (EUP) softmax reciprocal.
    assert jnp.allclose(q, q_ref, rtol=1e-2, atol=1e-2), (q, q_ref)

    # TODO(synk): reset_noise() is a stateful training-time RNG side effect; noise is
    # sampled once deterministically and folded into the effective weights above.
    print("KERNEL_OK")
</pallas_src>

<mosaic_0001>
module attributes {stable_mosaic.version = 11 : i64} {
  func.func @network_kernel(%arg0: i32, %arg1: memref<8x16xf32, #tpu.memory_space<vmem>>, %arg2: memref<16x128xf32, #tpu.memory_space<vmem>>, %arg3: memref<1x128xf32, #tpu.memory_space<vmem>>, %arg4: memref<128x256xf32, #tpu.memory_space<vmem>>, %arg5: memref<1x256xf32, #tpu.memory_space<vmem>>, %arg6: memref<256x40xf32, #tpu.memory_space<vmem>>, %arg7: memref<1x40xf32, #tpu.memory_space<vmem>>, %arg8: memref<8x1xf32, #tpu.memory_space<vmem>>, %arg9: memref<8x4xf32, #tpu.memory_space<vmem>>) attributes {dimension_semantics = [#tpu.dimension_semantics<parallel>], iteration_bounds = array<i64: 1>, scalar_prefetch = 0 : i64, scratch_operands = 0 : i64, tpu.core_type = #tpu.core_type<tc>, window_params = [{transform_indices = @transform_0, window_bounds = array<i64: 8, 16>}, {pipeline_mode = #tpu.pipeline_mode<synchronous>, transform_indices = @transform_1, window_bounds = array<i64: 16, 128>}, {pipeline_mode = #tpu.pipeline_mode<synchronous>, transform_indices = @transform_2, window_bounds = array<i64: 1, 128>}, {pipeline_mode = #tpu.pipeline_mode<synchronous>, transform_indices = @transform_3, window_bounds = array<i64: 128, 256>}, {pipeline_mode = #tpu.pipeline_mode<synchronous>, transform_indices = @transform_4, window_bounds = array<i64: 1, 256>}, {pipeline_mode = #tpu.pipeline_mode<synchronous>, transform_indices = @transform_5, window_bounds = array<i64: 256, 40>}, {pipeline_mode = #tpu.pipeline_mode<synchronous>, transform_indices = @transform_6, window_bounds = array<i64: 1, 40>}, {pipeline_mode = #tpu.pipeline_mode<synchronous>, transform_indices = @transform_7, window_bounds = array<i64: 8, 1>}, {transform_indices = @transform_8, window_bounds = array<i64: 8, 4>}]} {
    %c0 = arith.constant 0 : index
    %c0_0 = arith.constant 0 : index
    %0 = vector.load %arg1[%c0, %c0_0] : memref<8x16xf32, #tpu.memory_space<vmem>>, vector<8x16xf32>
    %c0_1 = arith.constant 0 : index
    %c0_2 = arith.constant 0 : index
    %1 = vector.load %arg2[%c0_1, %c0_2] : memref<16x128xf32, #tpu.memory_space<vmem>>, vector<16x128xf32>
    %cst = arith.constant dense<0.000000e+00> : vector<8x128xf32>
    %2 = tpu.matmul %0, %1, %cst {dimension_numbers = #tpu.dot_dimension_numbers<[1], [0], [0], [1], [0, 0, 1, 1], [], []>} : vector<8x16xf32>, vector<16x128xf32>, vector<8x128xf32> -> vector<8x128xf32>
    %c0_3 = arith.constant 0 : index
    %c0_4 = arith.constant 0 : index
    %3 = vector.load %arg3[%c0_3, %c0_4] : memref<1x128xf32, #tpu.memory_space<vmem>>, vector<1x128xf32>
    %4 = vector.broadcast %3 : vector<1x128xf32> to vector<8x128xf32>
    %5 = arith.addf %2, %4 : vector<8x128xf32>
    %cst_5 = arith.constant 0.000000e+00 : f32
    %6 = vector.broadcast %cst_5 : f32 to vector<8x128xf32>
    %7 = arith.maximumf %5, %6 : vector<8x128xf32>
    %c0_6 = arith.constant 0 : index
    %c0_7 = arith.constant 0 : index
    %8 = vector.load %arg4[%c0_6, %c0_7] : memref<128x256xf32, #tpu.memory_space<vmem>>, vector<128x256xf32>
    %cst_8 = arith.constant dense<0.000000e+00> : vector<8x256xf32>
    %9 = tpu.matmul %7, %8, %cst_8 {dimension_numbers = #tpu.dot_dimension_numbers<[1], [0], [0], [1], [0, 0, 1, 1], [], []>} : vector<8x128xf32>, vector<128x256xf32>, vector<8x256xf32> -> vector<8x256xf32>
    %c0_9 = arith.constant 0 : index
    %c0_10 = arith.constant 0 : index
    %10 = vector.load %arg5[%c0_9, %c0_10] : memref<1x256xf32, #tpu.memory_space<vmem>>, vector<1x256xf32>
    %11 = vector.broadcast %10 : vector<1x256xf32> to vector<8x256xf32>
    %12 = arith.addf %9, %11 : vector<8x256xf32>
    %cst_11 = arith.constant 0.000000e+00 : f32
    %13 = vector.broadcast %cst_11 : f32 to vector<8x256xf32>
    %14 = arith.maximumf %12, %13 : vector<8x256xf32>
    %c0_12 = arith.constant 0 : index
    %c0_13 = arith.constant 0 : index
    %15 = vector.load %arg6[%c0_12, %c0_13] : memref<256x40xf32, #tpu.memory_space<vmem>>, vector<256x40xf32>
    %cst_14 = arith.constant dense<0.000000e+00> : vector<8x40xf32>
    %16 = tpu.matmul %14, %15, %cst_14 {dimension_numbers = #tpu.dot_dimension_numbers<[1], [0], [0], [1], [0, 0, 1, 1], [], []>} : vector<8x256xf32>, vector<256x40xf32>, vector<8x40xf32> -> vector<8x40xf32>
    %c0_15 = arith.constant 0 : index
    %c0_16 = arith.constant 0 : index
    %17 = vector.load %arg7[%c0_15, %c0_16] : memref<1x40xf32, #tpu.memory_space<vmem>>, vector<1x40xf32>
    %18 = vector.broadcast %17 : vector<1x40xf32> to vector<8x40xf32>
    %19 = arith.addf %16, %18 : vector<8x40xf32>
    %20 = vector.extract_strided_slice %19 {offsets = [0, 0], sizes = [8, 32], strides = [1, 1]} : vector<8x40xf32> to vector<8x32xf32>
    %21 = vector.extract_strided_slice %19 {offsets = [0, 32], sizes = [8, 8], strides = [1, 1]} : vector<8x40xf32> to vector<8x8xf32>
    %22 = vector.extract_strided_slice %20 {offsets = [0, 0], sizes = [8, 8], strides = [1, 1]} : vector<8x32xf32> to vector<8x8xf32>
    %23 = vector.extract_strided_slice %20 {offsets = [0, 8], sizes = [8, 8], strides = [1, 1]} : vector<8x32xf32> to vector<8x8xf32>
    %24 = vector.extract_strided_slice %20 {offsets = [0, 16], sizes = [8, 8], strides = [1, 1]} : vector<8x32xf32> to vector<8x8xf32>
    %25 = vector.extract_strided_slice %20 {offsets = [0, 24], sizes = [8, 8], strides = [1, 1]} : vector<8x32xf32> to vector<8x8xf32>
    %26 = arith.addf %22, %23 : vector<8x8xf32>
    %27 = arith.addf %26, %24 : vector<8x8xf32>
    %28 = arith.addf %27, %25 : vector<8x8xf32>
    %cst_17 = arith.constant 2.500000e-01 : f32
    %29 = vector.broadcast %cst_17 : f32 to vector<8x8xf32>
    %30 = arith.mulf %28, %29 : vector<8x8xf32>
    %31 = arith.subf %21, %30 : vector<8x8xf32>
    %32 = arith.addf %22, %31 : vector<8x8xf32>
    %33 = arith.addf %23, %31 : vector<8x8xf32>
    %34 = arith.addf %24, %31 : vector<8x8xf32>
    %35 = arith.addf %25, %31 : vector<8x8xf32>
    %36 = tpu.concatenate %32, %33, %34, %35 in 0 : vector<8x8xf32>, vector<8x8xf32>, vector<8x8xf32>, vector<8x8xf32> -> vector<32x8xf32>
    %cst_18 = arith.constant dense<0xFF800000> : vector<32xf32>
    %37 = vector.multi_reduction <maximumf>, %36, %cst_18 [1] : vector<32x8xf32> to vector<32xf32>
    %38 = vector.shape_cast %37 : vector<32xf32> to vector<32x1xf32>
    %39 = vector.broadcast %38 : vector<32x1xf32> to vector<32x8xf32>
    %40 = arith.subf %36, %39 : vector<32x8xf32>
    %41 = math.exp %40 : vector<32x8xf32>
    %cst_19 = arith.constant dense<0.000000e+00> : vector<32xf32>
    %42 = vector.multi_reduction <add>, %41, %cst_19 [1] : vector<32x8xf32> to vector<32xf32>
    %43 = vector.shape_cast %42 : vector<32xf32> to vector<32x1xf32>
    %44 = tpu.reciprocal %43 {approx = true} : vector<32x1xf32> -> vector<32x1xf32>
    %45 = vector.broadcast %44 : vector<32x1xf32> to vector<32x8xf32>
    %46 = arith.mulf %41, %45 : vector<32x8xf32>
    %cst_20 = arith.constant 1.000000e-03 : f32
    %47 = vector.broadcast %cst_20 : f32 to vector<32x8xf32>
    %48 = arith.maximumf %46, %47 : vector<32x8xf32>
    %c0_21 = arith.constant 0 : index
    %c0_22 = arith.constant 0 : index
    %49 = vector.load %arg8[%c0_21, %c0_22] : memref<8x1xf32, #tpu.memory_space<vmem>>, vector<8x1xf32>
    %cst_23 = arith.constant dense<0.000000e+00> : vector<32x1xf32>
    %50 = tpu.matmul %48, %49, %cst_23 {dimension_numbers = #tpu.dot_dimension_numbers<[1], [0], [0], [1], [0, 0, 1, 1], [], []>} : vector<32x8xf32>, vector<8x1xf32>, vector<32x1xf32> -> vector<32x1xf32>
    %51 = vector.extract_strided_slice %50 {offsets = [0, 0], sizes = [8, 1], strides = [1, 1]} : vector<32x1xf32> to vector<8x1xf32>
    %52 = vector.extract_strided_slice %50 {offsets = [8, 0], sizes = [8, 1], strides = [1, 1]} : vector<32x1xf32> to vector<8x1xf32>
    %53 = vector.extract_strided_slice %50 {offsets = [16, 0], sizes = [8, 1], strides = [1, 1]} : vector<32x1xf32> to vector<8x1xf32>
    %54 = vector.extract_strided_slice %50 {offsets = [24, 0], sizes = [8, 1], strides = [1, 1]} : vector<32x1xf32> to vector<8x1xf32>
    %55 = tpu.concatenate %51, %52, %53, %54 in 1 : vector<8x1xf32>, vector<8x1xf32>, vector<8x1xf32>, vector<8x1xf32> -> vector<8x4xf32>
    %c0_24 = arith.constant 0 : index
    %c0_25 = arith.constant 0 : index
    %56 = vector.load %arg9[%c0_24, %c0_25] : memref<8x4xf32, #tpu.memory_space<vmem>>, vector<8x4xf32>
    tpu.vector_store %arg9[%c0_24, %c0_25], %55 {strides = array<i32>} : memref<8x4xf32, #tpu.memory_space<vmem>>, vector<8x4xf32>,
    return
  }
  func.func @transform_0(%arg0: i32) -> (i32, i32) {
    %c0_i32 = arith.constant 0 : i32
    %c0_i32_0 = arith.constant 0 : i32
    return %arg0, %c0_i32 : i32, i32
  }
  func.func @transform_1(%arg0: i32) -> (i32, i32) {
    %c0_i32 = arith.constant 0 : i32
    %c0_i32_0 = arith.constant 0 : i32
    %c0_i32_1 = arith.constant 0 : i32
    return %c0_i32, %c0_i32_0 : i32, i32
  }
  func.func @transform_2(%arg0: i32) -> (i32, i32) {
    %c0_i32 = arith.constant 0 : i32
    %c0_i32_0 = arith.constant 0 : i32
    %c0_i32_1 = arith.constant 0 : i32
    return %c0_i32, %c0_i32_0 : i32, i32
  }
  func.func @transform_3(%arg0: i32) -> (i32, i32) {
    %c0_i32 = arith.constant 0 : i32
    %c0_i32_0 = arith.constant 0 : i32
    %c0_i32_1 = arith.constant 0 : i32
    return %c0_i32, %c0_i32_0 : i32, i32
  }
  func.func @transform_4(%arg0: i32) -> (i32, i32) {
    %c0_i32 = arith.constant 0 : i32
    %c0_i32_0 = arith.constant 0 : i32
    %c0_i32_1 = arith.constant 0 : i32
    return %c0_i32, %c0_i32_0 : i32, i32
  }
  func.func @transform_5(%arg0: i32) -> (i32, i32) {
    %c0_i32 = arith.constant 0 : i32
    %c0_i32_0 = arith.constant 0 : i32
    %c0_i32_1 = arith.constant 0 : i32
    return %c0_i32, %c0_i32_0 : i32, i32
  }
  func.func @transform_6(%arg0: i32) -> (i32, i32) {
    %c0_i32 = arith.constant 0 : i32
    %c0_i32_0 = arith.constant 0 : i32
    %c0_i32_1 = arith.constant 0 : i32
    return %c0_i32, %c0_i32_0 : i32, i32
  }
  func.func @transform_7(%arg0: i32) -> (i32, i32) {
    %c0_i32 = arith.constant 0 : i32
    %c0_i32_0 = arith.constant 0 : i32
    %c0_i32_1 = arith.constant 0 : i32
    return %c0_i32, %c0_i32_0 : i32, i32
  }
  func.func @transform_8(%arg0: i32) -> (i32, i32) {
    %c0_i32 = arith.constant 0 : i32
    %c0_i32_0 = arith.constant 0 : i32
    return %arg0, %c0_i32 : i32, i32
  }
}

</mosaic_0001>

<bundles_post_ra>
// kernel: tpu_custom_call.1
= control target key start
LH: loop header
LB: loop body
LE: loop exit
PB: predicated region body
PF: predicated region fallthrough
CT: control target
= control target key end

     0   :  { %v718_v0 = vmov 0.0|0.0   ;;  %vm719_vm0 = vmmov 0   ;;  %v720_v3 = vmov 0.0   ;;  %vm39_vm1 = vcmask 130048   ;;  %s723_s19 = smov 112   ;;  %s724_s20 = smov 32   ;;  %s1002_s1 = inlined_call_operand.vmem [shape: f32[16,128], index: 1, kind: input, shape index: {}]   ;;  %s1003_s0 = inlined_call_operand.vmem [shape: f32[8,16], index: 0, kind: input, shape index: {}]   ;;  %s1004_s3 = inlined_call_operand.vmem [shape: f32[128,256], index: 3, kind: input, shape index: {}]   ;;  %s1005_s5 = inlined_call_operand.vmem [shape: f32[256,40], index: 5, kind: input, shape index: {}]   ;;  %s1006_s2 = inlined_call_operand.vmem [shape: f32[1,128], index: 2, kind: input, shape index: {}]   ;;  %s1007_s4 = inlined_call_operand.vmem [shape: f32[1,256], index: 4, kind: input, shape index: {}]   ;;  %s1008_s6 = inlined_call_operand.vmem [shape: f32[1,40], index: 6, kind: input, shape index: {}]   ;;  %s1009_s7 = inlined_call_operand.vmem [shape: f32[8,1], index: 7, kind: input, shape index: {}]   ;;  %s1010_s8 = inlined_call_operand.vmem [shape: f32[8,4], index: 8, kind: output, shape index: {}]  }
   0x1   :  { %624 = vmatprep.subr.bf16.mxu0 %v718_v0  ;;  %v30_v1 = vld [vmem:[%s1002_s1] sm:$0xff]  ;;  %v31_v2 = vld [vmem:[%s1002_s1 + $0x8] sm:$0xff]  ;;  %613 = vmatprep.mubr.msk.f32.mxu0 %vm719_vm0, %v720_v3  ;;  %v117_v7 = vld [vmem:[%s1004_s3 + $0x18] sm:$0xff]  ;;  %vm388_vm2 = vcmask 64512   ;;  %s727_s23 = smov 2   ;;  %s728_s24 = smov 3  }
   0x2   :  { %v625_v4 = vpack.c.bf16 %v31_v2, %v30_v1  ;;  %v29_v5 = vld [vmem:[%s1003_s0] sm:$0xff]  ;;  %v115_v6 = vld [vmem:[%s1004_s3 + $0x8] sm:$0xff]  ;;  %222 = vmatprep.mubr.f32.mxu1 %v720_v3  ;;  %v116_v10 = vld [vmem:[%s1004_s3 + $0x10] sm:$0xff]  ;;  %s722_s0 = smov 120   ;;  %vm547_vm3 = vcmask 7168   ;;  %vm549_vm4 = vcmask 15360  }
   0x3   :  { %v114_v8 = vld [vmem:[%s1004_s3] sm:$0xff]  ;;  %v627_v9 = vpack.c.bf16 %v117_v7, %v115_v6  ;;  %v119_v11 = vld [vmem:[%s1004_s3 + $0x28] sm:$0xff]  ;;  %v121_v12 = vld [vmem:[%s1004_s3 + $0x38] sm:$0xff]  ;;  %vm551_vm5 = vcmask 23552   ;;  %vm553_vm6 = vcmask 31744  }
   0x4   :  { %626 = vmatpush3.bf16.msra.mxu0 %v625_v4  ;;  %v629_v13 = vpack.c.bf16 %v116_v10, %v114_v8  ;;  %v631_v14 = vpack.c.bf16 %v121_v12, %v119_v11  ;;  %v118_v15 = vld [vmem:[%s1004_s3 + $0x20] sm:$0xff]  ;;  %v120_v16 = vld [vmem:[%s1004_s3 + $0x30] sm:$0xff]  ;;  %v123_v17 = vld [vmem:[%s1004_s3 + $0x48] sm:$0xff] }
   0x5   :  { %628 = vmatprep.subr.bf16.mxu1 %v627_v9  ;;  %v125_v18 = vld [vmem:[%s1004_s3 + $0x58] sm:$0xff]  ;;  %v633_v19 = vpack.c.bf16 %v120_v16, %v118_v15  ;;  %v122_v21 = vld [vmem:[%s1004_s3 + $0x40] sm:$0xff]  ;;  %v124_v22 = vld [vmem:[%s1004_s3 + $0x50] sm:$0xff] }
   0x6   :  { %630 = vmatpush1.bf16.msra.mxu1 %v629_v13  ;;  %v635_v20 = vpack.c.bf16 %v125_v18, %v123_v17  ;;  %v127_v23 = vld [vmem:[%s1004_s3 + $0x68] sm:$0xff]  ;;  %v129_v24 = vld [vmem:[%s1004_s3 + $0x78] sm:$0xff]  ;;  %v637_v25 = vpack.c.bf16 %v124_v22, %v122_v21  ;;  %v126_v27 = vld [vmem:[%s1004_s3 + $0x60] sm:$0xff] }
   0x7   :  { %614 = vmatmul.mubr.msk.f32.vlgmr.msra.gmra.mrb[0].mxu0 %vm39_vm1, %v29_v5  ;;  %632 = vmatprep.subr.bf16.mxu1 %v631_v14  ;;  %v639_v26 = vpack.c.bf16 %v129_v24, %v127_v23  ;;  %v128_v28 = vld [vmem:[%s1004_s3 + $0x70] sm:$0xff]  ;;  %v131_v29 = vld [vmem:[%s1004_s3 + $0x88] sm:$0xff]  ;;  %v133_v30 = vld [vmem:[%s1004_s3 + $0x98] sm:$0xff] }
   0x8   :  { %v641_v31 = vpack.c.bf16 %v128_v28, %v126_v27  ;;  %v643_v32 = vpack.c.bf16 %v133_v30, %v131_v29  ;;  %v130_v33 = vld [vmem:[%s1004_s3 + $0x80] sm:$0xff]  ;;  %v132_v34 = vld [vmem:[%s1004_s3 + $0x90] sm:$0xff]  ;;  %v135_v35 = vld [vmem:[%s1004_s3 + $0xa8] sm:$0xff] }
   0x9   :  { %v137_v36 = vld [vmem:[%s1004_s3 + $0xb8] sm:$0xff]  ;;  %v645_v37 = vpack.c.bf16 %v132_v34, %v130_v33  ;;  %v134_v39 = vld [vmem:[%s1004_s3 + $0xa0] sm:$0xff]  ;;  %v136_v40 = vld [vmem:[%s1004_s3 + $0xb0] sm:$0xff] }
   0xa   :  { %634 = vmatpush1.bf16.msra.mxu1 %v633_v19  ;;  %v647_v38 = vpack.c.bf16 %v137_v36, %v135_v35  ;;  %v139_v41 = vld [vmem:[%s1004_s3 + $0xc8] sm:$0xff]  ;;  %v141_v42 = vld [vmem:[%s1004_s3 + $0xd8] sm:$0xff]  ;;  %v649_v43 = vpack.c.bf16 %v136_v40, %v134_v39  ;;  %v138_v45 = vld [vmem:[%s1004_s3 + $0xc0] sm:$0xff] }
   0xb   :  { %636 = vmatprep.subr.bf16.mxu1 %v635_v20  ;;  %v651_v44 = vpack.c.bf16 %v141_v42, %v139_v41  ;;  %v140_v46 = vld [vmem:[%s1004_s3 + $0xd0] sm:$0xff]  ;;  %v143_v48 = vld [vmem:[%s1004_s3 + $0xe8] sm:$0xff]  ;;  %v145_v49 = vld [vmem:[%s1004_s3 + $0xf8] sm:$0xff] }
   0xc   :  { %v653_v47 = vpack.c.bf16 %v140_v46, %v138_v45  ;;  %v655_v50 = vpack.c.bf16 %v145_v49, %v143_v48  ;;  %v142_v51 = vld [vmem:[%s1004_s3 + $0xe0] sm:$0xff]  ;;  %v144_v52 = vld [vmem:[%s1004_s3 + $0xf0] sm:$0xff]  ;;  %v248_v55 = vld [vmem:[%s1005_s5 + $0x88] sm:$0xff] }
   0xd   :  { %v657_v53 = vpack.c.bf16 %v144_v52, %v142_v51  ;;  %v247_v54 = vld [vmem:[%s1005_s5 + $0x80] sm:$0xff]  ;;  %v232_v58 = vld [vmem:[%s1005_s5 + $0x8] sm:$0xff]  ;;  %v249_v59 = vld [vmem:[%s1005_s5 + $0x90] sm:$0xff] }
   0xe   :  { %638 = vmatpush1.bf16.msra.mxu1 %v637_v25  ;;  %v231_v56 = vld [vmem:[%s1005_s5] sm:$0xff]  ;;  %v659_v57 = vpack.c.bf16 %v248_v55, %v247_v54  ;;  %v250_v60 = vld [vmem:[%s1005_s5 + $0x98] sm:$0xff]  ;;  %v233_v63 = vld [vmem:[%s1005_s5 + $0x10] sm:$0xff] }
   0xf   :  { %640 = vmatprep.subr.bf16.mxu1 %v639_v26  ;;  %v661_v61 = vpack.c.bf16 %v232_v58, %v231_v56  ;;  %v663_v62 = vpack.c.bf16 %v250_v60, %v249_v59  ;;  %v234_v0 = vld [vmem:[%s1005_s5 + $0x18] sm:$0xff]  ;;  %v251_v1 = vld [vmem:[%s1005_s5 + $0xa0] sm:$0xff]  ;;  %v252_v2 = vld [vmem:[%s1005_s5 + $0xa8] sm:$0xff] }
  0x10   :  { %660 = vmatprep.subr.bf16.mxu0 %v659_v57  ;;  %v665_v3 = vpack.c.bf16 %v234_v0, %v233_v63  ;;  %v667_v4 = vpack.c.bf16 %v252_v2, %v251_v1  ;;  %v235_v5 = vld [vmem:[%s1005_s5 + $0x20] sm:$0xff]  ;;  %v236_v6 = vld [vmem:[%s1005_s5 + $0x28] sm:$0xff]  ;;  %v253_v7 = vld [vmem:[%s1005_s5 + $0xb0] sm:$0xff] }
  0x11   :  { %662 = vmatpush3.bf16.msra.mxu0 %v661_v61  ;;  %v254_v8 = vld [vmem:[%s1005_s5 + $0xb8] sm:$0xff]  ;;  %v669_v9 = vpack.c.bf16 %v236_v6, %v235_v5  ;;  %v237_v11 = vld [vmem:[%s1005_s5 + $0x30] sm:$0xff]  ;;  %v255_v13 = vld [vmem:[%s1005_s5 + $0xc0] sm:$0xff] }
  0x12   :  { %642 = vmatpush1.bf16.msra.mxu1 %v641_v31  ;;  %664 = vmatprep.subr.bf16.mxu0 %v663_v62  ;;  %v671_v10 = vpack.c.bf16 %v254_v8, %v253_v7  ;;  %v238_v12 = vld [vmem:[%s1005_s5 + $0x38] sm:$0xff]  ;;  %v256_v14 = vld [vmem:[%s1005_s5 + $0xc8] sm:$0xff]  ;;  %v239_v17 = vld [vmem:[%s1005_s5 + $0x40] sm:$0xff] }
  0x13   :  { %644 = vmatprep.subr.bf16.mxu1 %v643_v32  ;;  %v673_v15 = vpack.c.bf16 %v238_v12, %v237_v11  ;;  %v675_v16 = vpack.c.bf16 %v256_v14, %v255_v13  ;;  %v240_v18 = vld [vmem:[%s1005_s5 + $0x48] sm:$0xff]  ;;  %v257_v19 = vld [vmem:[%s1005_s5 + $0xd0] sm:$0xff]  ;;  %v258_v20 = vld [vmem:[%s1005_s5 + $0xd8] sm:$0xff] }
  0x14   :  { %v677_v21 = vpack.c.bf16 %v240_v18, %v239_v17  ;;  %v679_v22 = vpack.c.bf16 %v258_v20, %v257_v19  ;;  %v241_v23 = vld [vmem:[%s1005_s5 + $0x50] sm:$0xff]  ;;  %v242_v24 = vld [vmem:[%s1005_s5 + $0x58] sm:$0xff]  ;;  %v259_v25 = vld [vmem:[%s1005_s5 + $0xe0] sm:$0xff] }
  0x15   :  { %666 = vmatpush3.bf16.msra.mxu0 %v665_v3  ;;  %v260_v26 = vld [vmem:[%s1005_s5 + $0xe8] sm:$0xff]  ;;  %v681_v27 = vpack.c.bf16 %v242_v24, %v241_v23  ;;  %v559_v29 = vld [vmem:[%s1006_s2] ss:$0 sm:$0xff]  ;;  %v245_v40 = vld [vmem:[%s1005_s5 + $0x70] sm:$0xff] }
  0x16   :  { %646 = vmatpush1.bf16.msra.mxu1 %v645_v37  ;;  %668 = vmatprep.subr.bf16.mxu0 %v667_v4  ;;  %v683_v28 = vpack.c.bf16 %v260_v26, %v259_v25  ;;  %v243_v34 = vld [vmem:[%s1005_s5 + $0x60] sm:$0xff]  ;;  %v244_v35 = vld [vmem:[%s1005_s5 + $0x68] sm:$0xff]  ;;  %v261_v37 = vld [vmem:[%s1005_s5 + $0xf0] sm:$0xff] }
  0x17   :  { %648 = vmatprep.subr.bf16.mxu1 %v647_v38  ;;  %v685_v36 = vpack.c.bf16 %v244_v35, %v243_v34  ;;  %v262_v38 = vld [vmem:[%s1005_s5 + $0xf8] sm:$0xff]  ;;  %v146_v46 = vld [vmem:[%s1007_s4] sm:$0x3]  ;;  %s721_s4 = smov 104  }
  0x18   :  { %v687_v39 = vpack.c.bf16 %v262_v38, %v261_v37  ;;  %v246_v41 = vld [vmem:[%s1005_s5 + $0x78] sm:$0xff]  ;;  %v561_v57 = vld [vmem:[%s1008_s6] ss:$0 sm:$0xff]  ;;  %s725_s6 = smov 96  }
  0x19   :  { %670 = vmatpush3.bf16.msra.mxu0 %v669_v9  ;;  %v689_v42 = vpack.c.bf16 %v246_v41, %v245_v40  ;;  %v437_v41 = vld [vmem:[%s1009_s7] sm:$0xff]  ;;  %s726_s7 = smov 1  }
  0x1a   :  { %650 = vmatpush1.bf16.msra.mxu1 %v649_v43  ;;  %672 = vmatprep.subr.bf16.mxu0 %v671_v10  ;;  %v148_v43 = vlaneseq }
  0x1b   :  { %652 = vmatprep.subr.bf16.mxu1 %v651_v44 }
  0x1c   :  { %v149_v44 = vshrl.u32 %v148_v43, 7 }
  0x1d   :  { %674 = vmatpush3.bf16.msra.mxu0 %v673_v15 }
  0x1e   :  { %654 = vmatpush1.bf16.msra.mxu1 %v653_v47  ;;  %676 = vmatprep.subr.bf16.mxu0 %v675_v16  ;;  %v150_v45 = vsub.s32 0, %v149_v44  ;;  %v154_v47 = vsub.s32 1, %v149_v44 }
  0x1f   :  { %656 = vmatprep.subr.bf16.mxu1 %v655_v50 }
  0x20   :  { %v151_v48 = vrot.slane %v146_v46, %v150_v45  ;;  %v155_v49 = vrot.slane %v146_v46, %v154_v47 }
  0x21   :  { %678 = vmatpush3.bf16.msra.mxu0 %v677_v21 }
  0x22   :  { %658 = vmatpush1.bf16.msra.mxu1 %v657_v53  ;;  %680 = vmatprep.subr.bf16.mxu0 %v679_v22 }
  0x23   :  { %616 = vmatprep.subr.mxu1 %v437_v41 }
  0x25   :  { %682 = vmatpush3.bf16.msra.mxu0 %v681_v27 }
  0x26   :  { %684 = vmatprep.subr.bf16.mxu0 %v683_v28 }
  0x29   :  { %686 = vmatpush3.bf16.msra.mxu0 %v685_v36 }
  0x2a   :  { %688 = vmatprep.subr.bf16.mxu0 %v687_v39 }
  0x2d   :  { %690 = vmatpush3.bf16.msra.mxu0 %v689_v42 }
  0xda   :  { %v109_v30 = vpop.f32.mrb[0].mxu0 }
  0xdb   :  { %v110_v31 = vadd.f32 %v559_v29, %v109_v30  ;;  %v615_v32 = vpop.f32.mrb[1].mxu0 }
  0xdd   :  { %v113_v33 = vmax.f32 %v110_v31, 0.0 }
  0xdf   :  { %223 = vmatmul.mubr.f32.vlgmr.msra.gmra.mrb[0].mxu1 %v113_v33 }
  0xe0   :  { %617 = vmatpush3.msra.mxu1 %v437_v41 }
 0x1b2   :  { %v224_v50 = vpop.f32.mrb[0].mxu1 }
 0x1b3   :  { %v225_v51 = vadd.f32 %v224_v50, %v151_v48  ;;  %v226_v52 = vpop.f32.mrb[1].mxu1 }
 0x1b4   :  { %v227_v53 = vadd.f32 %v226_v52, %v155_v49 }
 0x1b5   :  { %v229_v55 = vmax.f32 %v225_v51, 0.0 }
 0x1b6   :  { %v230_v54 = vmax.f32 %v227_v53, 0.0 }
 0x1b8   :  { %334 = vmatprep.mubr.f32.mxu0 %v230_v54 }
 0x1b9   :  { %335 = vmatmul.mubr.f32.vlgmr.msra.gmra.mrb[2].mxu0 %v229_v55 }
 0x28c   :  { %v601_v56 = vpop.f32.mrb[2].mxu0 }
 0x28d   :  { %v602_v58 = vpop.f32.mrb[3].mxu0 }
 0x28e   :  { %v603_v59 = vadd.f32 %v602_v58, %v601_v56 }
 0x290   :  { %v337_v60 = vadd.f32 %v603_v59, %v561_v57 }
 0x292   :  { %349 = vrot.lane.b32.xlu1 %v337_v60, %s721_s4  ;;  %341 = vrot.lane.b32.xlu0 %v337_v60, %s722_s0 }
 0x296   :  { %345 = vrot.lane.b32.xlu0 %v337_v60, %s723_s19 }
 0x304   :  { %v342_v61 = vpop.permute.xlu0 %341  ;;  %v350_v1 = vpop.permute.xlu1 %349 }
 0x305   :  { %v344_v62 = vadd.f32 %v342_v61, %v337_v60 }
 0x308   :  { %v346_v63 = vpop.permute.xlu0 %345 }
 0x309   :  { %v348_v0 = vadd.f32 %v346_v63, %v344_v62 }
 0x30b   :  { %v352_v2 = vadd.f32 %v350_v1, %v348_v0 }
 0x30d   :  { %v353_v3 = vmul.f32 0.25, %v352_v2 }
 0x30f   :  { %355 = vrot.lane.b32.xlu1 %v353_v3, %s724_s20 }
 0x381   :  { %v356_v4 = vpop.permute.xlu1 %355 }
 0x382   :  { %v358_v5 = vsub.f32 %v337_v60, %v356_v4 }
 0x384   :  { %368 = vrot.lane.b32.xlu1 %v358_v5, %s723_s19  ;;  %364 = vrot.lane.b32.xlu0 %v358_v5, %s721_s4 }
 0x388   :  { %360 = vrot.lane.b32.xlu1 %v358_v5, %s725_s6  ;;  %372 = vrot.lane.b32.xlu0 %v358_v5, %s722_s0 }
 0x3f6   :  { %v369_v6 = vpop.permute.xlu1 %368  ;;  %v365_v7 = vpop.permute.xlu0 %364 }
 0x3f7   :  { %v371_v8 = vadd.f32 %v369_v6, %v337_v60  ;;  %v367_v9 = vadd.f32 %v365_v7, %v337_v60 }
 0x3f9   :  { %381 = vrot.lane.b32.xlu1 %v371_v8, %s723_s19  ;;  %377 = vrot.lane.b32.xlu0 %v367_v9, %s722_s0 }
 0x3fa   :  { %v373_v10 = vpop.permute.xlu0 %372  ;;  %v361_v12 = vpop.permute.xlu1 %360 }
 0x3fb   :  { %v375_v11 = vadd.f32 %v373_v10, %v337_v60  ;;  %v363_v13 = vadd.f32 %v361_v12, %v337_v60 }
 0x3fd   :  { %385 = vrot.lane.b32.xlu0 %v375_v11, %s721_s4  ;;  %v389_v14 = vsel %vm388_vm2, %v363_v13, -inf }
 0x41d   :  { %390 = vmax.xlane.f32.xlu1 %v389_v14 }
 0x46b   :  { %v378_v15 = vpop.permute.xlu0 %377  ;;  %v382_v17 = vpop.permute.xlu1 %381 }
 0x46c   :  { %v392_v16 = vsel %vm388_vm2, %v378_v15, -inf  ;;  %v395_v19 = vsel %vm388_vm2, %v382_v17, -inf }
 0x46d   :  { %393 = vmax.xlane.f32.xlu0 %v392_v16 }
 0x46f   :  { %v386_v18 = vpop.permute.xlu0 %385 }
 0x470   :  { %v398_v20 = vsel %vm388_vm2, %v386_v18, -inf }
 0x471   :  { %396 = vmax.xlane.f32.xlu0 %v395_v19  ;;  %399 = vmax.xlane.f32.xlu1 %v398_v20 }
 0x4aa   :  { %v391_v21 = vpop.xlane.xlu1 %390 }
 0x4ab   :  { %v401_v22 = vsub.f32 %v363_v13, %v391_v21 }
 0x4ad   :  { %v405_v23 = vmul.f32 1.442695, %v401_v22 }
 0x4af   :  { %702 = vpow2.f32 %v405_v23 }
 0x4b9   :  { %v703_v24 = vpop.eup %702 }
 0x4ba   :  { %v413_v25 = vsel %vm388_vm2, %v703_v24, 0.0 }
 0x4bb   :  { %414 = vadd.xlane.f32.xlu0 %v413_v25 }
 0x4fa   :  { %v394_v26 = vpop.xlane.xlu0 %393 }
 0x4fb   :  { %v402_v27 = vsub.f32 %v378_v15, %v394_v26 }
 0x4fd   :  { %v407_v28 = vmul.f32 1.442695, %v402_v27 }
 0x4fe   :  { %v400_v29 = vpop.xlane.xlu1 %399  ;;  %v397_v30 = vpop.xlane.xlu0 %396 }
 0x4ff   :  { %704 = vpow2.f32 %v407_v28  ;;  %v404_v31 = vsub.f32 %v386_v18, %v400_v29  ;;  %v403_v32 = vsub.f32 %v382_v17, %v397_v30 }
 0x501   :  { %v411_v33 = vmul.f32 1.442695, %v404_v31  ;;  %v409_v34 = vmul.f32 1.442695, %v403_v32 }
 0x503   :  { %706 = vpow2.f32 %v411_v33 }
 0x504   :  { %708 = vpow2.f32 %v409_v34 }
 0x509   :  { %v705_v35 = vpop.eup %704 }
 0x50a   :  { %v416_v36 = vsel %vm388_vm2, %v705_v35, 0.0 }
 0x50b   :  { %417 = vadd.xlane.f32.xlu1 %v416_v36 }
 0x50d   :  { %v707_v37 = vpop.eup %706 }
 0x50e   :  { %v709_v38 = vpop.eup %708  ;;  %v422_v39 = vsel %vm388_vm2, %v707_v37, 0.0 }
 0x50f   :  { %423 = vadd.xlane.f32.xlu1 %v422_v39  ;;  %v419_v40 = vsel %vm388_vm2, %v709_v38, 0.0 }
 0x510   :  { %420 = vadd.xlane.f32.xlu0 %v419_v40 }
 0x548   :  { %v415_v42 = vpop.xlane.xlu0 %414 }
 0x549   :  { %710 = vrcp.f32 %v415_v42 }
 0x553   :  { %v711_v43 = vpop.eup %710 }
 0x554   :  { %v429_v44 = vmul.f32 %v711_v43, %v703_v24 }
 0x556   :  { %v433_v45 = vmax.f32 %v429_v44, 0.001 }
 0x558   :  { %618 = vmatprep.mubr.msk.f32.mxu1 %vm388_vm2, %v433_v45 }
 0x598   :  { %v418_v46 = vpop.xlane.xlu1 %417 }
 0x599   :  { %712 = vrcp.f32 %v418_v46 }
 0x59c   :  { %v424_v47 = vpop.xlane.xlu1 %423 }
 0x59d   :  { %714 = vrcp.f32 %v424_v47  ;;  %v421_v48 = vpop.xlane.xlu0 %420 }
 0x59e   :  { %716 = vrcp.f32 %v421_v48 }
 0x5a3   :  { %v713_v49 = vpop.eup %712 }
 0x5a4   :  { %v430_v50 = vmul.f32 %v713_v49, %v705_v35 }
 0x5a6   :  { %v434_v51 = vmax.f32 %v430_v50, 0.001 }
 0x5a7   :  { %v715_v52 = vpop.eup %714 }
 0x5a8   :  { %v717_v53 = vpop.eup %716  ;;  %619 = vmatmul.mubr.msk.f32.vlgmr.msra.gmra.mrb[2].mxu1 %vm388_vm2, %v434_v51  ;;  %v432_v54 = vmul.f32 %v715_v52, %v707_v37 }
 0x5a9   :  { %v431_v55 = vmul.f32 %v717_v53, %v709_v38 }
 0x5aa   :  { %v436_v56 = vmax.f32 %v432_v54, 0.001 }
 0x5ab   :  { %v435_v57 = vmax.f32 %v431_v55, 0.001 }
 0x5ad   :  { %621 = vmatprep.mubr.msk.f32.mxu1 %vm388_vm2, %v435_v57 }
 0x5ae   :  { %622 = vmatmul.mubr.msk.f32.gmra.mrb[4].mxu1 %vm388_vm2, %v436_v56 }
 0x67b   :  { %v620_v58 = vpop.f32.mrb[2].mxu1 }
 0x67c   :  { %536 = vrot.lane.b32.xlu0 %v620_v58, %s726_s7  ;;  %v516_v59 = vpop.f32.mrb[3].mxu1 }
 0x681   :  { %v623_v60 = vpop.f32.mrb[4].mxu1 }
 0x682   :  { %v526_v61 = vpop.f32.mrb[5].mxu1 }
 0x683   :  { %540 = vrot.lane.b32.xlu1 %v526_v61, %s727_s23 }
 0x687   :  { %544 = vrot.lane.b32.xlu1 %v623_v60, %s728_s24 }
 0x6ee   :  { %v537_v62 = vpop.permute.xlu0 %536 }
 0x6ef   :  { %v548_v0 = vsel %vm547_vm3, %v516_v59, %v537_v62 }
 0x6f5   :  { %v541_v63 = vpop.permute.xlu1 %540 }
 0x6f6   :  { %v550_v1 = vsel %vm549_vm4, %v548_v0, %v541_v63 }
 0x6f9   :  { %v545_v2 = vpop.permute.xlu1 %544 }
 0x6fa   :  { %v552_v3 = vsel %vm551_vm5, %v550_v1, %v545_v2 }
 0x6fb   :  { %554 = vst.msk [vmem:[%s1010_s8] sm:$0xff] %vm553_vm6, %v552_v3 }

</bundles_post_ra>
